<compile_context>
chip_gen: v5e
topology: v5e:2x2
jax: 0.10.0
libtpu: 0.0.40
codegen_flags: <defaults>
</compile_context>

<pallas_src>
import functools

import jax
import jax.numpy as jnp
from jax.experimental import pallas as pl
from jax.experimental.pallas import tpu as pltpu


# ---------------------------------------------------------------------------
# helpers
# ---------------------------------------------------------------------------
def _round_up(x, m):
    return (x + m - 1) // m * m


def _cdiv(a, b):
    return (a + b - 1) // b


def _feat(d):
    # Feature dims <= 128 stay at true width (block dim == full array dim is legal,
    # avoids inflating HBM traffic); larger dims are lane-padded to x128.
    return d if d <= 128 else _round_up(d, 128)


def _pad2(a, rows, cols):
    r, c = a.shape
    if r == rows and c == cols:
        return a
    return jnp.pad(a, ((0, rows - r), (0, cols - c)))


def _device_kind():
    try:
        return jax.devices()[0].device_kind.lower()
    except Exception:  # pragma: no cover - e.g. no devices
        return ""


def _vmem_plan(kind):
    """(batch-tile target, usable scoped-VMEM cap in bytes) per TPU generation."""
    if "v7" in kind or "tpu7" in kind:
        return 256, 48 * 1024 * 1024        # 64 MiB physical per TensorCore
    if "v6" in kind or "tpu6" in kind:
        return 1024, 100 * 1024 * 1024      # 128 MiB physical
    if any(t in kind for t in ("v5", "v4", "v3", "v2")):
        return 512, 96 * 1024 * 1024        # 128 MiB physical
    return 512, 64 * 1024 * 1024            # unknown: conservative


def _vmem_estimate(tb, din, dh, drep, dout, in_b, w_b):
    """Kernel VMEM footprint: resident weights + double-buffered I/O + temporaries."""
    weights = (din * dh + dh * drep) * w_b + drep * dout * 4 \
              + (dh + drep + dout) * 4
    io = 2 * (2 * tb * din) * in_b + 2 * tb * dout * 4
    temps = 2 * tb * dh * (4 + w_b) + 2 * tb * drep * 4 \
            + tb * drep * 4 + tb * dout * 4          # h(f32), h(mm), r, d, head acc
    return weights + io + temps


# ---------------------------------------------------------------------------
# kernel
# ---------------------------------------------------------------------------
def twin_regressor_kernel(xs_ref, w1_ref, b1_ref, w2_ref, b2_ref,
                          wh_ref, bh_ref, o_ref):
    """One batch tile of the fused TwinRegressor forward.

    xs_ref is the wrapper-stacked (2*TB, Din) block: rows [:TB] are the x1 tile,
    rows [TB:] are the x2 tile, so each encoder layer runs once per tile.
    """
    tb = o_ref.shape[0]
    x = xs_ref[...]                                          # (2*TB, Din), mm dtype

    # Layer 1: Linear(in_dim, 128) + ReLU.  MXU in mm dtype, f32 accumulation,
    # bias add + ReLU on the VPU in f32.
    h = jnp.dot(x, w1_ref[...], preferred_element_type=jnp.float32) + b1_ref[...]
    h = jnp.maximum(h, 0.0).astype(w2_ref.dtype)

    # Layer 2: Linear(128, rep_dim) + ReLU.
    r = jnp.dot(h, w2_ref[...], preferred_element_type=jnp.float32) + b2_ref[...]
    r = jnp.maximum(r, 0.0)

    # Twin difference and head stay in f32 (cancellation-sensitive, ~1% of FLOPs).
    d = r[:tb, :] - r[tb:, :]
    o_ref[...] = (jnp.dot(d, wh_ref[...], preferred_element_type=jnp.float32)
                  + bh_ref[...]).astype(o_ref.dtype)


# ---------------------------------------------------------------------------
# params: one-time padding / casting (hoisted out of the per-call wrapper)
# ---------------------------------------------------------------------------
def prepare_params(params, *, use_bf16=True):
    """Pad / cast weights once.  Encoder weights go to bf16 (f32 accumulation in
    the kernel); the head weight/bias stay f32."""
    w1, b1, w2, b2, wh, bh = params
    in_dim, hidden = w1.shape
    rep_dim = w2.shape[1]
    out_dim = wh.shape[1]
    mm = jnp.bfloat16 if use_bf16 else jnp.float32
    Din, Dh, Drep, Dout = _feat(in_dim), _feat(hidden), _feat(rep_dim), _feat(out_dim)
    return dict(
        w1=_pad2(w1, Din, Dh).astype(mm),
        b1=_pad2(b1, 1, Dh).astype(jnp.float32),
        w2=_pad2(w2, Dh, Drep).astype(mm),
        b2=_pad2(b2, 1, Drep).astype(jnp.float32),
        wh=_pad2(wh, Drep, Dout).astype(jnp.float32),    # head kept in f32
        bh=_pad2(bh, 1, Dout).astype(jnp.float32),
        dims=(in_dim, hidden, rep_dim, out_dim),
        use_bf16=use_bf16,
    )


# ---------------------------------------------------------------------------
# wrapper
# ---------------------------------------------------------------------------
def twin_regressor(x1, x2, prepared, *, batch_tile=None):
    """Fused forward: head(enc(x1) - enc(x2)).  Returns (B, out_dim) float32."""
    w1p, b1p = prepared["w1"], prepared["b1"]
    w2p, b2p = prepared["w2"], prepared["b2"]
    whp, bhp = prepared["wh"], prepared["bh"]
    _, _, _, out_dim = prepared["dims"]
    use_bf16 = prepared["use_bf16"]

    Din, Dh = w1p.shape
    Drep = w2p.shape[1]
    Dout = whp.shape[1]
    in_dtype = jnp.bfloat16 if use_bf16 else jnp.float32
    in_b = w_b = 2 if use_bf16 else 4

    B = x1.shape[0]
    kind = _device_kind()
    is_v7 = "v7" in kind or "tpu7" in kind
    target, vmem_cap = _vmem_plan(kind)

    if batch_tile is not None:
        TB = _round_up(min(batch_tile, max(B, 8)), 8)
    else:
        TB = _round_up(min(target, max(B, 8)), 8)
        # v7x has 2 TensorCores: make sure the "parallel" batch axis has >= 2 steps.
        if is_v7 and B > 8 and _cdiv(B, TB) < 2:
            TB = _round_up(_cdiv(B, 2), 8)
        # Shrink the tile until the full VMEM footprint fits comfortably.
        while TB > 8 and _vmem_estimate(TB, Din, Dh, Drep, Dout, in_b, w_b) > int(0.75 * vmem_cap):
            TB = _round_up(TB // 2, 8)

    Bpad = _round_up(max(B, TB), TB)
    ntiles = Bpad // TB

    # Wrapper-side twin stacking, fused by XLA with the bf16 cast / zero-pad:
    # tile i of xs holds x1[i*TB:(i+1)*TB] in rows [:TB] and x2[...] in rows [TB:].
    x1p = _pad2(x1, Bpad, Din).astype(in_dtype).reshape(ntiles, TB, Din)
    x2p = _pad2(x2, Bpad, Din).astype(in_dtype).reshape(ntiles, TB, Din)
    xs = jnp.concatenate([x1p, x2p], axis=1)             # (ntiles, 2*TB, Din)

    x_spec = pl.BlockSpec((None, 2 * TB, Din), lambda i: (i, 0, 0))
    vmem_full = pl.BlockSpec(memory_space=pltpu.MemorySpace.VMEM)  # resident, 1-buffered

    flops = int(2 * (2 * Bpad) * (Din * Dh + Dh * Drep) + 2 * Bpad * Drep * Dout)
    bytes_accessed = int(xs.size * in_b + Bpad * Dout * 4
                         + (w1p.size + w2p.size) * w_b + whp.size * 4
                         + (Dh + Drep + Dout) * 4)

    est = _vmem_estimate(TB, Din, Dh, Drep, Dout, in_b, w_b)
    vmem_limit = int(min(vmem_cap, max(int(est * 1.5), 24 * 1024 * 1024)))

    out = pl.pallas_call(
        twin_regressor_kernel,
        out_shape=jax.ShapeDtypeStruct((Bpad, Dout), jnp.float32),
        grid_spec=pltpu.PrefetchScalarGridSpec(
            num_scalar_prefetch=0,
            grid=(ntiles,),
            in_specs=[x_spec,
                      vmem_full, vmem_full,      # w1, b1
                      vmem_full, vmem_full,      # w2, b2
                      vmem_full, vmem_full],     # wh, bh
            out_specs=pl.BlockSpec((TB, Dout), lambda i: (i, 0)),
        ),
        compiler_params=pltpu.CompilerParams(
            dimension_semantics=("parallel",),
            vmem_limit_bytes=vmem_limit),
        cost_estimate=pl.CostEstimate(flops=flops, transcendentals=0,
                                      bytes_accessed=bytes_accessed),
    )(xs, w1p, b1p, w2p, b2p, whp, bhp)

    return out[:B, :out_dim]


# ---------------------------------------------------------------------------
# params init + pure-JAX reference
# ---------------------------------------------------------------------------
def init_params(key, in_dim, rep_dim, out_dim, hidden=128):
    """PyTorch-Linear-style uniform(+/- 1/sqrt(fan_in)) init.
    Weights stored as (in_features, out_features) (transposed vs torch)."""
    ks = jax.random.split(key, 6)

    def linear(kw, kb, fan_in, fan_out):
        bound = 1.0 / (fan_in ** 0.5)
        w = jax.random.uniform(kw, (fan_in, fan_out), jnp.float32, -bound, bound)
        b = jax.random.uniform(kb, (1, fan_out), jnp.float32, -bound, bound)
        return w, b

    w1, b1 = linear(ks[0], ks[1], in_dim, hidden)
    w2, b2 = linear(ks[2], ks[3], hidden, rep_dim)
    wh, bh = linear(ks[4], ks[5], rep_dim, out_dim)
    return (w1, b1, w2, b2, wh, bh)


def twin_regressor_ref(x1, x2, params):
    w1, b1, w2, b2, wh, bh = params

    def enc(x):
        h = jnp.maximum(x @ w1 + b1, 0.0)
        return jnp.maximum(h @ w2 + b2, 0.0)

    return (enc(x1) - enc(x2)) @ wh + bh


# ---------------------------------------------------------------------------
# demo / correctness check
# ---------------------------------------------------------------------------
if __name__ == "__main__":
    batch, in_dim, rep_dim, out_dim = 16, 32, 32, 8

    key = jax.random.PRNGKey(0)
    k_x1, k_x2, k_p = jax.random.split(key, 3)

    x1 = jax.random.normal(k_x1, (batch, in_dim), jnp.float32)
    x2 = jax.random.normal(k_x2, (batch, in_dim), jnp.float32)
    params = init_params(k_p, in_dim, rep_dim, out_dim)

    # Pad/cast the weights once, outside the jitted per-call wrapper.
    prepared = prepare_params(params, use_bf16=True)

    # batch_tile=8 exercises the multi-step batch grid (grid=(2,)) at demo size.
    fwd = jax.jit(functools.partial(twin_regressor, prepared=prepared, batch_tile=8))
    out = jax.block_until_ready(fwd(x1, x2))

    ref = twin_regressor_ref(x1, x2, params)
    assert out.shape == (batch, out_dim), out.shape
    # bf16 MXU operands with f32 accumulation; diff + head are full f32.
    assert jnp.allclose(out, ref, atol=5e-2, rtol=5e-2), \
        float(jnp.max(jnp.abs(out - ref)))

    print("KERNEL_OK")
</pallas_src>

<mosaic_0001>
module attributes {stable_mosaic.version = 11 : i64} {
  func.func @twin_regressor_kernel(%arg0: i32, %arg1: memref<1x16x32xbf16, #tpu.memory_space<vmem>>, %arg2: memref<32x128xbf16, #tpu.memory_space<vmem>>, %arg3: memref<1x128xf32, #tpu.memory_space<vmem>>, %arg4: memref<128x32xbf16, #tpu.memory_space<vmem>>, %arg5: memref<1x32xf32, #tpu.memory_space<vmem>>, %arg6: memref<32x8xf32, #tpu.memory_space<vmem>>, %arg7: memref<1x8xf32, #tpu.memory_space<vmem>>, %arg8: memref<8x8xf32, #tpu.memory_space<vmem>>) attributes {dimension_semantics = [#tpu.dimension_semantics<parallel>], iteration_bounds = array<i64: 2>, scalar_prefetch = 0 : i64, scratch_operands = 0 : i64, tpu.core_type = #tpu.core_type<tc>, window_params = [{transform_indices = @transform_0, window_bounds = array<i64: 1, 16, 32>}, {pipeline_mode = #tpu.pipeline_mode<synchronous>, transform_indices = @transform_1, window_bounds = array<i64: 32, 128>}, {pipeline_mode = #tpu.pipeline_mode<synchronous>, transform_indices = @transform_2, window_bounds = array<i64: 1, 128>}, {pipeline_mode = #tpu.pipeline_mode<synchronous>, transform_indices = @transform_3, window_bounds = array<i64: 128, 32>}, {pipeline_mode = #tpu.pipeline_mode<synchronous>, transform_indices = @transform_4, window_bounds = array<i64: 1, 32>}, {pipeline_mode = #tpu.pipeline_mode<synchronous>, transform_indices = @transform_5, window_bounds = array<i64: 32, 8>}, {pipeline_mode = #tpu.pipeline_mode<synchronous>, transform_indices = @transform_6, window_bounds = array<i64: 1, 8>}, {transform_indices = @transform_7, window_bounds = array<i64: 8, 8>}]} {
    %c0 = arith.constant 0 : index
    %c0_0 = arith.constant 0 : index
    %c0_1 = arith.constant 0 : index
    %0 = vector.load %arg1[%c0, %c0_0, %c0_1] : memref<1x16x32xbf16, #tpu.memory_space<vmem>>, vector<1x16x32xbf16>
    %1 = vector.shape_cast %0 : vector<1x16x32xbf16> to vector<16x32xbf16>
    %c0_2 = arith.constant 0 : index
    %c0_3 = arith.constant 0 : index
    %2 = vector.load %arg2[%c0_2, %c0_3] : memref<32x128xbf16, #tpu.memory_space<vmem>>, vector<32x128xbf16>
    %cst = arith.constant dense<0.000000e+00> : vector<16x128xf32>
    %3 = tpu.matmul %1, %2, %cst {dimension_numbers = #tpu.dot_dimension_numbers<[1], [0], [0], [1], [0, 0, 1, 1], [], []>} : vector<16x32xbf16>, vector<32x128xbf16>, vector<16x128xf32> -> vector<16x128xf32>
    %c0_4 = arith.constant 0 : index
    %c0_5 = arith.constant 0 : index
    %4 = vector.load %arg3[%c0_4, %c0_5] : memref<1x128xf32, #tpu.memory_space<vmem>>, vector<1x128xf32>
    %5 = vector.broadcast %4 : vector<1x128xf32> to vector<16x128xf32>
    %6 = arith.addf %3, %5 : vector<16x128xf32>
    %cst_6 = arith.constant 0.000000e+00 : f32
    %7 = vector.broadcast %cst_6 : f32 to vector<16x128xf32>
    %8 = arith.maximumf %6, %7 : vector<16x128xf32>
    %9 = arith.truncf %8 : vector<16x128xf32> to vector<16x128xbf16>
    %c0_7 = arith.constant 0 : index
    %c0_8 = arith.constant 0 : index
    %10 = vector.load %arg4[%c0_7, %c0_8] : memref<128x32xbf16, #tpu.memory_space<vmem>>, vector<128x32xbf16>
    %cst_9 = arith.constant dense<0.000000e+00> : vector<16x32xf32>
    %11 = tpu.matmul %9, %10, %cst_9 {dimension_numbers = #tpu.dot_dimension_numbers<[1], [0], [0], [1], [0, 0, 1, 1], [], []>} : vector<16x128xbf16>, vector<128x32xbf16>, vector<16x32xf32> -> vector<16x32xf32>
    %c0_10 = arith.constant 0 : index
    %c0_11 = arith.constant 0 : index
    %12 = vector.load %arg5[%c0_10, %c0_11] : memref<1x32xf32, #tpu.memory_space<vmem>>, vector<1x32xf32>
    %13 = vector.broadcast %12 : vector<1x32xf32> to vector<16x32xf32>
    %14 = arith.addf %11, %13 : vector<16x32xf32>
    %cst_12 = arith.constant 0.000000e+00 : f32
    %15 = vector.broadcast %cst_12 : f32 to vector<16x32xf32>
    %16 = arith.maximumf %14, %15 : vector<16x32xf32>
    %17 = vector.extract_strided_slice %16 {offsets = [0, 0], sizes = [8, 32], strides = [1, 1]} : vector<16x32xf32> to vector<8x32xf32>
    %18 = vector.extract_strided_slice %16 {offsets = [8, 0], sizes = [8, 32], strides = [1, 1]} : vector<16x32xf32> to vector<8x32xf32>
    %19 = arith.subf %17, %18 : vector<8x32xf32>
    %c0_13 = arith.constant 0 : index
    %c0_14 = arith.constant 0 : index
    %20 = vector.load %arg6[%c0_13, %c0_14] : memref<32x8xf32, #tpu.memory_space<vmem>>, vector<32x8xf32>
    %cst_15 = arith.constant dense<0.000000e+00> : vector<8x8xf32>
    %21 = tpu.matmul %19, %20, %cst_15 {dimension_numbers = #tpu.dot_dimension_numbers<[1], [0], [0], [1], [0, 0, 1, 1], [], []>} : vector<8x32xf32>, vector<32x8xf32>, vector<8x8xf32> -> vector<8x8xf32>
    %c0_16 = arith.constant 0 : index
    %c0_17 = arith.constant 0 : index
    %22 = vector.load %arg7[%c0_16, %c0_17] : memref<1x8xf32, #tpu.memory_space<vmem>>, vector<1x8xf32>
    %23 = vector.broadcast %22 : vector<1x8xf32> to vector<8x8xf32>
    %24 = arith.addf %21, %23 : vector<8x8xf32>
    %c0_18 = arith.constant 0 : index
    %c0_19 = arith.constant 0 : index
    %25 = vector.load %arg8[%c0_18, %c0_19] : memref<8x8xf32, #tpu.memory_space<vmem>>, vector<8x8xf32>
    tpu.vector_store %arg8[%c0_18, %c0_19], %24 {strides = array<i32>} : memref<8x8xf32, #tpu.memory_space<vmem>>, vector<8x8xf32>,
    return
  }
  func.func @transform_0(%arg0: i32) -> (i32, i32, i32) {
    %c0_i32 = arith.constant 0 : i32
    %c0_i32_0 = arith.constant 0 : i32
    %c0_i32_1 = arith.constant 0 : i32
    return %arg0, %c0_i32, %c0_i32_0 : i32, i32, i32
  }
  func.func @transform_1(%arg0: i32) -> (i32, i32) {
    %c0_i32 = arith.constant 0 : i32
    %c0_i32_0 = arith.constant 0 : i32
    %c0_i32_1 = arith.constant 0 : i32
    return %c0_i32, %c0_i32_0 : i32, i32
  }
  func.func @transform_2(%arg0: i32) -> (i32, i32) {
    %c0_i32 = arith.constant 0 : i32
    %c0_i32_0 = arith.constant 0 : i32
    %c0_i32_1 = arith.constant 0 : i32
    return %c0_i32, %c0_i32_0 : i32, i32
  }
  func.func @transform_3(%arg0: i32) -> (i32, i32) {
    %c0_i32 = arith.constant 0 : i32
    %c0_i32_0 = arith.constant 0 : i32
    %c0_i32_1 = arith.constant 0 : i32
    return %c0_i32, %c0_i32_0 : i32, i32
  }
  func.func @transform_4(%arg0: i32) -> (i32, i32) {
    %c0_i32 = arith.constant 0 : i32
    %c0_i32_0 = arith.constant 0 : i32
    %c0_i32_1 = arith.constant 0 : i32
    return %c0_i32, %c0_i32_0 : i32, i32
  }
  func.func @transform_5(%arg0: i32) -> (i32, i32) {
    %c0_i32 = arith.constant 0 : i32
    %c0_i32_0 = arith.constant 0 : i32
    %c0_i32_1 = arith.constant 0 : i32
    return %c0_i32, %c0_i32_0 : i32, i32
  }
  func.func @transform_6(%arg0: i32) -> (i32, i32) {
    %c0_i32 = arith.constant 0 : i32
    %c0_i32_0 = arith.constant 0 : i32
    %c0_i32_1 = arith.constant 0 : i32
    return %c0_i32, %c0_i32_0 : i32, i32
  }
  func.func @transform_7(%arg0: i32) -> (i32, i32) {
    %c0_i32 = arith.constant 0 : i32
    %c0_i32_0 = arith.constant 0 : i32
    return %arg0, %c0_i32 : i32, i32
  }
}

</mosaic_0001>

<bundles_post_ra>
// kernel: twin_regressor.1
= control target key start
LH: loop header
LB: loop body
LE: loop exit
PB: predicated region body
PF: predicated region fallthrough
CT: control target
= control target key end

     0   :  { %12 = vsyncpa [#allocation3], 0  ;;  %s705_s24 = smov 0   ;;  %s773_s0 = inlined_call_operand.vmem [shape: bf16[2,16,32], index: 0, kind: input, shape index: {}]   ;;  %s774_s1 = inlined_call_operand.vmem [shape: bf16[32,128], index: 1, kind: input, shape index: {}]   ;;  %s775_s2 = inlined_call_operand.vmem [shape: f32[1,128], index: 2, kind: input, shape index: {}]   ;;  %s776_s3 = inlined_call_operand.vmem [shape: bf16[128,32], index: 3, kind: input, shape index: {}]   ;;  %s777_s4 = inlined_call_operand.vmem [shape: f32[1,32], index: 4, kind: input, shape index: {}]   ;;  %s778_s5 = inlined_call_operand.hbm [shape: f32[32,8], index: 5, kind: input, shape index: {}]   ;;  %s779_s6 = inlined_call_operand.vmem [shape: f32[1,8], index: 6, kind: input, shape index: {}]   ;;  %s780_s7 = inlined_call_operand.vmem [shape: f32[16,8], index: 7, kind: output, shape index: {}]  }
   0x1 LB: > { %s224_s27 = sshll.u32 %s778_s5, 4  ;;  %s526_s28 = sadd.s32 4294967295, %s660_s24   ;;  %s660_s24 = sphi %s705_s24, %s18_s24   ;;  %s225_s27 = int_to_ptr.hbm [resolvable:$true] %s224_s27 }
   0x2   : > { %p528_p0 = scmp.ge.s32.totalorder %s660_s24, 1  ;;  %p201_p1 = scmp.lt.s32.totalorder %s660_s24, 3 }
   0x3   : > { %p604_p2 = scmp.eq.s32.totalorder %s526_s28, 0  ;;  %s662_s29 = smov [#allocation2]  }
   0x4   : > { %p202_p3 = pnand %p528_p0, %p201_p1  ;;  %s226_s30 = sshll.u32 %s662_s29, 4  ;;  %s227_s30 = int_to_ptr.vmem [resolvable:$true] %s226_s30 }
   0x5   : > { %s663_s8 = smov 128   ;;  %s664_s9 = smov 8  }
   0x6   : > { %p600_p4 = pneg %p202_p3  ;;  %253 = sbr.rel (%p202_p3) target bundleno = 435 (0x1b3), region = 48 }
   0x8   : > { %p601_p5 = pnand %p604_p2, %p600_p4 }
   0xa   : > { %603 = dma.hbm_to_vmem [thread:$0]  (!%p601_p5), %s225_s27, 512, %s227_s30, [#allocation3], %s663_s8, %s663_s8, %s664_s9  }
   0xb   : > { %655 = dma.done.wait (%p604_p2), [#allocation3], 512  }
   0xc   : > { %657 = vsyncadd (%p604_p2), [#allocation3], 4294966784  ;;  %p285_p6 = scmp.lt.s32.totalorder %s526_s28, 1  ;;  %v587_v0 = vld [vmem:[%s774_s1 + $0x8] sm:$0xff]  ;;  %v595_v1 = vld [vmem:[%s776_s3 + $0x38] sm:$0xff]  ;;  %vm322_vm0 = vcmask 261120  }
   0xd   : > { %332 = vmatpush.bf16.msra.mxu0 %v587_v0  ;;  %v586_v2 = vld [vmem:[%s774_s1] sm:$0xff]  ;;  %411 = vmatpush.bf16.msra.mxu1 %v595_v1  ;;  %v594_v3 = vld [vmem:[%s776_s3 + $0x30] sm:$0xff]  ;;  %v593_v5 = vld [vmem:[%s776_s3 + $0x28] sm:$0xff]  ;;  %vm459_vm1 = vcmask 64512  }
   0xe   : > { %s782_s28 = smov (!%p285_p6, %s526_s28), 1  ;;  %v592_v6 = vld [vmem:[%s776_s3 + $0x20] sm:$0xff]  ;;  %v591_v7 = vld [vmem:[%s776_s3 + $0x18] sm:$0xff]  ;;  %v590_v8 = vld [vmem:[%s776_s3 + $0x10] sm:$0xff] }
   0xf   : > { %s584_s10 = sshll.u32 %s782_s28, 3  ;;  %v589_v9 = vld [vmem:[%s776_s3 + $0x8] sm:$0xff]  ;;  %v588_v10 = vld [vmem:[%s776_s3] sm:$0xff]  ;;  %v431_v19 = vld [vmem:[#allocation2 + $0x18] sm:$0xff] }
  0x10   : > { %s289_s19 = scalar_lea.vmem %s773_s0, %s584_s10  ;;  %v617_v12 = vld [vmem:[%s775_s2] ss:$0 sm:$0xff]  ;;  %451 = vmatpush.msra.mxu2 %v431_v19  ;;  %v430_v20 = vld [vmem:[#allocation2 + $0x10] sm:$0xff]  ;;  %v429_v21 = vld [vmem:[#allocation2 + $0x8] sm:$0xff]  ;;  %s293_s22 = scalar_lea.vmem %s780_s7, %s584_s10 }
  0x11   : > { %v585_v4 = vld [vmem:[%s289_s19] sm:$0xff]  ;;  %333 = vmatpush.bf16.msra.mxu0 %v586_v2  ;;  %412 = vmatpush.bf16.msra.mxu1 %v594_v3 }
  0x12   : > { %452 = vmatpush.msra.mxu2 %v430_v20  ;;  %v428_v22 = vld [vmem:[#allocation2] sm:$0xff] }
  0x13   : > { %v618_v24 = vld [vmem:[%s777_s4] ss:$0 sm:$0xff] }
  0x14   : > { %548 = vmatmul.msk.bf16.vlgmr.msra.gmra.mxu0 %vm322_vm0, %v585_v4  ;;  %453 = vmatpush.msra.mxu2 %v429_v21  ;;  %v619_v31 = vld [vmem:[%s779_s6] ss:$0 sm:$0xff] }
  0x15   : > { %413 = vmatpush.bf16.msra.mxu1 %v593_v5 }
  0x16   : > { %454 = vmatpush.msra.mxu2 %v428_v22 }
  0x19   : > { %414 = vmatpush.bf16.msra.mxu1 %v592_v6 }
  0x1d   : > { %415 = vmatpush.bf16.msra.mxu1 %v591_v7 }
  0x21   : > { %416 = vmatpush.bf16.msra.mxu1 %v590_v8 }
  0x25   : > { %417 = vmatpush.bf16.msra.mxu1 %v589_v9 }
  0x29   : > { %418 = vmatpush.bf16.msra.mxu1 %v588_v10 }
  0x91   : > { %v335_v11 = vpop.f32.mrf.mxu0 }
  0x92   : > { %v336_v13 = vadd.f32 %v617_v12, %v335_v11 }
  0x94   : > { %v340_v16 = vmax.f32 %v336_v13, 0.0 }
  0x99   : > { %v337_v14 = vpop.f32.mrf.mxu0 }
  0x9a   : > { %v338_v15 = vadd.f32 %v617_v12, %v337_v14 }
  0x9c   : > { %v341_v17 = vmax.f32 %v338_v15, 0.0 }
  0x9e   : > { %v342_v18 = vpack.c.bf16 %v341_v17, %v340_v16 }
  0xa0   : > { %419 = vmatmul.bf16.vlgmr.msra.gmra.mxu1 %v342_v18 }
 0x11d   : > { %v420_v23 = vpop.f32.mrf.mxu1 }
 0x11e   : > { %v421_v25 = vadd.f32 %v618_v24, %v420_v23 }
 0x120   : > { %v425_v28 = vmax.f32 %v421_v25, 0.0 }
 0x125   : > { %v422_v26 = vpop.f32.mrf.mxu1 }
 0x126   : > { %v423_v27 = vadd.f32 %v618_v24, %v422_v26 }
 0x128   : > { %v426_v29 = vmax.f32 %v423_v27, 0.0 }
 0x12a   : > { %v427_v30 = vsub.f32 %v425_v28, %v426_v29 }
 0x12c   : > { %581 = vmatmul.msk.f32.vlgmr.msra.gmra.mxu2 %vm322_vm0, %v427_v30 }
 0x1af   : > { %v456_v32 = vpop.f32.mrf.mxu2 }
 0x1b0   : > { %v457_v33 = vadd.f32 %v619_v31, %v456_v32 }
 0x1b2   : > { %460 = vst.msk [vmem:[%s293_s22] sm:$0xff] %vm459_vm1, %v457_v33 }
 0x1b3 PF: > { %s18_s24 = sadd.s32 1, %s660_s24  }
 0x1b4   : > { %p15_p7 = scmp.ge.s32.totalorder %s18_s24, 4  }
 0x1b6   :  { %17 = sbr.rel (!%p15_p7) target bundleno = 1 (0x1), region = 83 }
 0x1bb   :  { %480 = vsyncpa [#allocation3], 1 }
 0x1bc   :  { %482 = vsyncpa [#allocation3 + $0x1], 1 }

</bundles_post_ra>
